<compile_context>
chip_gen: v7x
topology: tpu7x:2x2x1
jax: 0.10.0
libtpu: 0.0.40
codegen_flags: <defaults>
</compile_context>

<pallas_src>
import jax
import jax.numpy as jnp
from jax.experimental import pallas as pl
from jax.experimental.pallas import tpu as pltpu


def _round_up(x, m):
    return pl.cdiv(x, m) * m


def fused_affine_kernel(u_ref, v_ref, wu_ref, wv_ref, b_ref, o_ref):
    # One batch tile: (TB, 3) @ (3, 2) + (TB, 3) @ (3, 2) + bias broadcast.
    # With K=3 / N=2 the dot also performs the lane redistribution that a
    # hand-written VPU formulation would need XLU ops for; the kernel is
    # memory/load-bound so the MXU push is off the critical path.
    acc = jnp.dot(u_ref[...], wu_ref[...], preferred_element_type=jnp.float32)
    acc = acc + jnp.dot(v_ref[...], wv_ref[...],
                        preferred_element_type=jnp.float32)
    o_ref[...] = (acc + b_ref[...]).astype(o_ref.dtype)


def fuse_params(params):
    """Fold Model.linear1 + CustomModule (2*L1 + L2 - L1) into one affine map.

    out = u @ Wu + v @ Wv + b.  Parameter-only; compute once and reuse.
    """
    w1t = params["w1"].T                 # (3, 5)
    cw1t = params["cw1"].T               # (5, 2)
    cw2t = params["cw2"].T               # (5, 2)
    a = 2.0 * cw1t + cw2t                # x-path output weights      (5, 2)
    wu = w1t @ a                         # u-path fused weights       (3, 2)
    wv = -(w1t @ cw1t)                   # v-path fused weights       (3, 2)
    b = (params["b1"] @ a - params["b1"] @ cw1t
         + params["cb1"] + params["cb2"]).reshape(1, 2)              # (1, 2)
    return (wu.astype(jnp.float32), wv.astype(jnp.float32),
            b.astype(jnp.float32))


def model_forward(u, v, w, wu, wv, b, *, tb=8192, min_pallas_batch=1 << 15):
    """u, v, w: (B, 3) float32.  Returns (B, 2) float32.

    `w` is accepted for signature fidelity with Model.forward(u, v, w); its
    linear1(w) result is dead in the original module, so no work is done on it.
    """
    del w  # dead value in the PyTorch forward
    u = u.astype(jnp.float32)
    v = v.astype(jnp.float32)
    B = u.shape[0]

    # Small-B fast path: XLA's fused dot+add already hits the roofline and
    # avoids the fixed pallas_call launch / pipeline prologue cost.
    if B < min_pallas_batch:
        return u @ wu + v @ wv + b

    # Batch tile: multiple of 8 sublanes, at most `tb`, and small enough that
    # there are >=2 tiles (so the "parallel" axis shards over v7x's 2 TCs).
    TB = max(8, min(int(tb), _round_up(pl.cdiv(B, 2), 8)))
    grid = (pl.cdiv(B, TB),)

    return pl.pallas_call(
        fused_affine_kernel,
        out_shape=jax.ShapeDtypeStruct((B, 2), jnp.float32),
        grid=grid,
        in_specs=[
            pl.BlockSpec((TB, 3), lambda i: (i, 0)),   # u, batch-tiled
            pl.BlockSpec((TB, 3), lambda i: (i, 0)),   # v, batch-tiled
            pl.BlockSpec((3, 2), lambda i: (0, 0)),    # Wu, resident
            pl.BlockSpec((3, 2), lambda i: (0, 0)),    # Wv, resident
            pl.BlockSpec((1, 2), lambda i: (0, 0)),    # bias, resident
        ],
        out_specs=pl.BlockSpec((TB, 2), lambda i: (i, 0)),
        compiler_params=pltpu.CompilerParams(
            dimension_semantics=("parallel",),          # 2-TC sharding on v7x
            vmem_limit_bytes=36 * 1024 * 1024,          # fits TB=8192 on v5e too
        ),
    )(u, v, wu, wv, b)


def make_params(key):
    ks = jax.random.split(key, 6)
    return {
        "w1": jax.random.normal(ks[0], (5, 3), jnp.float32) * 0.5,   # Linear(3,5)
        "b1": jax.random.normal(ks[1], (5,), jnp.float32) * 0.1,
        "cw1": jax.random.normal(ks[2], (2, 5), jnp.float32) * 0.5,  # custom L1
        "cb1": jax.random.normal(ks[3], (2,), jnp.float32) * 0.1,
        "cw2": jax.random.normal(ks[4], (2, 5), jnp.float32) * 0.5,  # custom L2
        "cb2": jax.random.normal(ks[5], (2,), jnp.float32) * 0.1,
    }


def reference_forward(u, v, w, p):
    lin1 = lambda a: a @ p["w1"].T + p["b1"]
    cl1 = lambda a: a @ p["cw1"].T + p["cb1"]
    cl2 = lambda a: a @ p["cw2"].T + p["cb2"]
    x, y = lin1(u), lin1(v)
    _ = lin1(w)  # dead, matches PyTorch source
    return 2.0 * cl1(x) + cl2(x) - cl1(y)


if __name__ == "__main__":
    key = jax.random.PRNGKey(0)
    kp, ku, kv, kw = jax.random.split(key, 4)

    B = 20  # small; chosen non-multiple of the test tile to exercise the ragged block
    u = jax.random.normal(ku, (B, 3), jnp.float32)
    v = jax.random.normal(kv, (B, 3), jnp.float32)
    w = jax.random.normal(kw, (B, 3), jnp.float32)

    params = make_params(kp)
    wu, wv, b = fuse_params(params)          # parameter-only, computed once
    ref = reference_forward(u, v, w, params)

    # Force the Pallas path (min_pallas_batch=0) with a tiny tile so the grid
    # has several steps, including a ragged final block.
    out = model_forward(u, v, w, wu, wv, b, tb=8, min_pallas_batch=0)
    out = jax.block_until_ready(out)
    assert out.shape == (B, 2)
    assert jnp.allclose(out, ref, atol=1e-4, rtol=1e-4)

    # Also sanity-check the small-B XLA fast path dispatch.
    out_fast = jax.block_until_ready(model_forward(u, v, w, wu, wv, b))
    assert jnp.allclose(out_fast, ref, atol=1e-4, rtol=1e-4)

    print("KERNEL_OK")
</pallas_src>

<mosaic_0001>
module attributes {stable_mosaic.version = 11 : i64} {
  func.func @fused_affine_kernel(%arg0: i32, %arg1: memref<8x3xf32, #tpu.memory_space<vmem>>, %arg2: memref<8x3xf32, #tpu.memory_space<vmem>>, %arg3: memref<3x2xf32, #tpu.memory_space<vmem>>, %arg4: memref<3x2xf32, #tpu.memory_space<vmem>>, %arg5: memref<1x2xf32, #tpu.memory_space<vmem>>, %arg6: memref<8x2xf32, #tpu.memory_space<vmem>>) attributes {dimension_semantics = [#tpu.dimension_semantics<parallel>], iteration_bounds = array<i64: 3>, scalar_prefetch = 0 : i64, scratch_operands = 0 : i64, tpu.core_type = #tpu.core_type<tc>, window_params = [{transform_indices = @transform_0, window_bounds = array<i64: 8, 3>}, {transform_indices = @transform_1, window_bounds = array<i64: 8, 3>}, {pipeline_mode = #tpu.pipeline_mode<synchronous>, transform_indices = @transform_2, window_bounds = array<i64: 3, 2>}, {pipeline_mode = #tpu.pipeline_mode<synchronous>, transform_indices = @transform_3, window_bounds = array<i64: 3, 2>}, {pipeline_mode = #tpu.pipeline_mode<synchronous>, transform_indices = @transform_4, window_bounds = array<i64: 1, 2>}, {transform_indices = @transform_5, window_bounds = array<i64: 8, 2>}]} {
    %c0 = arith.constant 0 : index
    %c0_0 = arith.constant 0 : index
    %0 = vector.load %arg1[%c0, %c0_0] : memref<8x3xf32, #tpu.memory_space<vmem>>, vector<8x3xf32>
    %c0_1 = arith.constant 0 : index
    %c0_2 = arith.constant 0 : index
    %1 = vector.load %arg3[%c0_1, %c0_2] : memref<3x2xf32, #tpu.memory_space<vmem>>, vector<3x2xf32>
    %cst = arith.constant dense<0.000000e+00> : vector<8x2xf32>
    %2 = tpu.matmul %0, %1, %cst {dimension_numbers = #tpu.dot_dimension_numbers<[1], [0], [0], [1], [0, 0, 1, 1], [], []>} : vector<8x3xf32>, vector<3x2xf32>, vector<8x2xf32> -> vector<8x2xf32>
    %c0_3 = arith.constant 0 : index
    %c0_4 = arith.constant 0 : index
    %3 = vector.load %arg2[%c0_3, %c0_4] : memref<8x3xf32, #tpu.memory_space<vmem>>, vector<8x3xf32>
    %c0_5 = arith.constant 0 : index
    %c0_6 = arith.constant 0 : index
    %4 = vector.load %arg4[%c0_5, %c0_6] : memref<3x2xf32, #tpu.memory_space<vmem>>, vector<3x2xf32>
    %cst_7 = arith.constant dense<0.000000e+00> : vector<8x2xf32>
    %5 = tpu.matmul %3, %4, %cst_7 {dimension_numbers = #tpu.dot_dimension_numbers<[1], [0], [0], [1], [0, 0, 1, 1], [], []>} : vector<8x3xf32>, vector<3x2xf32>, vector<8x2xf32> -> vector<8x2xf32>
    %6 = arith.addf %2, %5 : vector<8x2xf32>
    %c0_8 = arith.constant 0 : index
    %c0_9 = arith.constant 0 : index
    %7 = vector.load %arg5[%c0_8, %c0_9] : memref<1x2xf32, #tpu.memory_space<vmem>>, vector<1x2xf32>
    %8 = vector.broadcast %7 : vector<1x2xf32> to vector<8x2xf32>
    %9 = arith.addf %6, %8 : vector<8x2xf32>
    %c0_10 = arith.constant 0 : index
    %c0_11 = arith.constant 0 : index
    %10 = vector.load %arg6[%c0_10, %c0_11] : memref<8x2xf32, #tpu.memory_space<vmem>>, vector<8x2xf32>
    tpu.vector_store %arg6[%c0_10, %c0_11], %9 {strides = array<i32>} : memref<8x2xf32, #tpu.memory_space<vmem>>, vector<8x2xf32>,
    return
  }
  func.func @transform_0(%arg0: i32) -> (i32, i32) {
    %c0_i32 = arith.constant 0 : i32
    %c0_i32_0 = arith.constant 0 : i32
    return %arg0, %c0_i32 : i32, i32
  }
  func.func @transform_1(%arg0: i32) -> (i32, i32) {
    %c0_i32 = arith.constant 0 : i32
    %c0_i32_0 = arith.constant 0 : i32
    return %arg0, %c0_i32 : i32, i32
  }
  func.func @transform_2(%arg0: i32) -> (i32, i32) {
    %c0_i32 = arith.constant 0 : i32
    %c0_i32_0 = arith.constant 0 : i32
    %c0_i32_1 = arith.constant 0 : i32
    return %c0_i32, %c0_i32_0 : i32, i32
  }
  func.func @transform_3(%arg0: i32) -> (i32, i32) {
    %c0_i32 = arith.constant 0 : i32
    %c0_i32_0 = arith.constant 0 : i32
    %c0_i32_1 = arith.constant 0 : i32
    return %c0_i32, %c0_i32_0 : i32, i32
  }
  func.func @transform_4(%arg0: i32) -> (i32, i32) {
    %c0_i32 = arith.constant 0 : i32
    %c0_i32_0 = arith.constant 0 : i32
    %c0_i32_1 = arith.constant 0 : i32
    return %c0_i32, %c0_i32_0 : i32, i32
  }
  func.func @transform_5(%arg0: i32) -> (i32, i32) {
    %c0_i32 = arith.constant 0 : i32
    %c0_i32_0 = arith.constant 0 : i32
    return %arg0, %c0_i32 : i32, i32
  }
}

</mosaic_0001>

<bundles_post_ra>
// kernel: tpu_custom_call.1
= control target key start
LH: loop header
LB: loop body
LE: loop exit
PB: predicated region body
PF: predicated region fallthrough
CT: control target
= control target key end

     0   :  { %s549_s18 = smov 0   ;;  %s578_s0 = inlined_call_operand.vmem [shape: f32[20,3], index: 0, kind: input, shape index: {}]   ;;  %s579_s1 = inlined_call_operand.vmem [shape: f32[20,3], index: 1, kind: input, shape index: {}]   ;;  %s580_s2 = inlined_call_operand.vmem [shape: f32[3,2], index: 2, kind: input, shape index: {}]   ;;  %s581_s3 = inlined_call_operand.vmem [shape: f32[3,2], index: 3, kind: input, shape index: {}]   ;;  %s582_s4 = inlined_call_operand.vmem [shape: f32[1,2], index: 4, kind: input, shape index: {}]   ;;  %s583_s5 = inlined_call_operand.vmem [shape: f32[20,2], index: 5, kind: output, shape index: {}]  }
   0x1 LB: > { %s470_s19 = sadd.s32 4294967295, %s515_s18   ;;  %p474_p0 = scmp.ge.s32.totalorder %s515_s18, 1  ;;  %s515_s18 = sphi %s549_s18, %s15_s18  }
   0x2   : > { %p195_p1 = scmp.lt.s32.totalorder %s515_s18, 4 }
   0x4   : > { %p196_p2 = pnand %p474_p0, %p195_p1 }
   0x5   : > { %v240_v0 = vld [vmem:[%s581_s3] sm:$0x7] (!%p196_p2)  ;;  %vm245_vm0 = vcmask (!%p196_p2), 1042432   ;;  %p225_p3 = scmp.lt.s32.totalorder (!%p196_p2), %s470_s19, 2  ;;  %v517_v1 = vmov (!%p196_p2), 0.0   ;;  %vm518_vm1 = vmmov (!%p196_p2), 0  }
   0x6   : > { %199 = sbr.rel (%p196_p2) target bundleno = 235 (0xeb), region = 40  ;;  %489 = vmatprep.subr.mxu0 (!%p196_p2), %v517_v1  ;;  %494 = vmatprep.subr.mxu1 (!%p196_p2), %v517_v1  ;;  %v238_v2 = vld [vmem:[%s580_s2] sm:$0x7] (!%p196_p2)  ;;  %vm241_vm2 = vcmask (!%p196_p2), 23552   ;;  %vm403_vm3 = vcmask (!%p196_p2), 15360  }
   0x7   : > { %490 = vmatpush3.msk.msra.mxu0 (!%p196_p2), %vm245_vm0, %v240_v0  ;;  %491 = vmatprep.mubr.msk.f32.mxu0 (!%p196_p2), %vm518_vm1, %v517_v1  ;;  %v482_v7 = vld [vmem:[%s582_s4] ss:$0 sm:$0xff] (!%p196_p2) }
   0x8   : > { %495 = vmatpush3.msk.msra.mxu1 (!%p196_p2), %vm245_vm0, %v238_v2  ;;  %496 = vmatprep.mubr.msk.f32.mxu1 (!%p196_p2), %vm518_vm1, %v517_v1 }
   0xd   : > { %s585_s19 = smov (!%p225_p3, %s470_s19), 2 }
   0xe   : > { %s475_s24 = sshll.u32 %s585_s19, 3 }
   0xf   : > { %s232_s27 = scalar_lea.vmem %s579_s1, %s475_s24  ;;  %s228_s30 = scalar_lea.vmem %s578_s0, %s475_s24 }
  0x10   : > { %v239_v3 = vld [vmem:[%s232_s27] sm:$0xff]  ;;  %s236_s10 = scalar_lea.vmem %s583_s5, %s475_s24 }
  0x11   : > { %492 = vmatmul.mubr.msk.f32.vlgmr.msra.gmra.mrb[0].mxu0 %vm241_vm2, %v239_v3  ;;  %v237_v4 = vld [vmem:[%s228_s30] sm:$0xff] }
  0x12   : > { %497 = vmatmul.mubr.msk.f32.vlgmr.msra.gmra.mrb[0].mxu1 %vm241_vm2, %v237_v4 }
  0xe4   : > { %v315_v5 = vpop.f32.mrb[0].mxu0 }
  0xe5   : > { %v391_v6 = vpop.f32.mrb[0].mxu1  ;;  %v493_v8 = vpop.f32.mrb[1].mxu0 }
  0xe6   : > { %v392_v9 = vadd.f32 %v391_v6, %v315_v5  ;;  %v498_v10 = vpop.f32.mrb[1].mxu1 }
  0xe8   : > { %v402_v11 = vadd.f32 %v482_v7, %v392_v9 }
  0xea   : > { %404 = vst.msk [vmem:[%s236_s10] sm:$0xff] %vm403_vm3, %v402_v11 }
  0xeb PF: > { %s15_s18 = sadd.s32 1, %s515_s18  }
  0xec   : > { %p12_p4 = scmp.ge.s32.totalorder %s15_s18, 5  }
  0xee   :  { %14 = sbr.rel (!%p12_p4) target bundleno = 1 (0x1), region = 73 }

</bundles_post_ra>
